<compile_context>
chip_gen: v7x
topology: tpu7x:2x2x1
jax: 0.10.0
libtpu: 0.0.40
codegen_flags: <defaults>
</compile_context>

<pallas_src>
import jax
import jax.numpy as jnp
from jax.experimental import pallas as pl
from jax.experimental.pallas import tpu as pltpu

LANES = 128


def adapter_kernel(x_ref, wd_ref, bd_ref, wu_ref, bu_ref, o_ref):
    # x_ref: (tm, Dp)  wd_ref: (Dp, Hp)  bd_ref: (1, Hp)  wu_ref: (Hp, Dp)  bu_ref: (1, Dp)
    x = x_ref[...]                                                   # native dtype

    # down_project + ReLU (MXU consumes native dtype; accumulate in f32)
    h = jnp.dot(x, wd_ref[...], preferred_element_type=jnp.float32)
    h = jnp.maximum(h + bd_ref[...].astype(jnp.float32), 0.0)
    # TODO(synk): 'gelu' activation variant would be jax.nn.gelu(h + bd) here.

    # up_project (cast hidden to weight dtype; no-op for f32)
    y = jnp.dot(h.astype(wu_ref.dtype), wu_ref[...],
                preferred_element_type=jnp.float32)

    # bias + skip connection in f32, single cast at the store
    y = y + bu_ref[...].astype(jnp.float32) + x.astype(jnp.float32)
    o_ref[...] = y.astype(o_ref.dtype)


def _round_up(a, b):
    return (a + b - 1) // b * b


def _vmem_ceiling_bytes():
    """~75% of per-core physical VMEM: ~48MiB on v7x, ~96MiB on v5e/v6e."""
    try:
        cap = getattr(pltpu.get_tpu_info(), "vmem_capacity_bytes", None)
        if cap:
            return int(cap) * 3 // 4
    except Exception:
        pass
    return 48 << 20   # conservative fallback, safe on v5e/v6e/v7x


def adapter_forward(x, w_down, b_down, w_up, b_up, *, tm=2048):
    """x: (..., dim); w_down: (dim, hidden); w_up: (hidden, dim) (pre-transposed)."""
    orig_shape = x.shape
    dim = orig_shape[-1]
    hidden = w_down.shape[1]

    x2 = x.reshape(-1, dim)
    m = x2.shape[0]

    # ---- lane-dense feature layout -----------------------------------------
    if dim < LANES and LANES % dim == 0:
        pack, d_p, lane_pad = LANES // dim, LANES, 0          # row packing
    elif dim % LANES == 0:
        pack, d_p, lane_pad = 1, dim, 0                       # already lane-dense
    else:
        pack = 1                                              # guard: pad to 128-lane mult.
        d_p = _round_up(dim, LANES)
        lane_pad = d_p - dim

    if pack > 1:
        eye = jnp.eye(pack, dtype=w_down.dtype)
        wd_p = jnp.kron(eye, w_down)                          # (d_p, h_p) block-diagonal
        wu_p = jnp.kron(eye.astype(w_up.dtype), w_up)         # (h_p, d_p) block-diagonal
        bd_p = jnp.tile(b_down, (pack,)).reshape(1, hidden * pack)
        bu_p = jnp.tile(b_up, (pack,)).reshape(1, d_p)
    else:
        wd_p, wu_p = w_down, w_up
        bd_p = b_down.reshape(1, hidden)
        bu_p = b_up.reshape(1, dim)
        if lane_pad:
            wd_p = jnp.pad(wd_p, ((0, lane_pad), (0, 0)))
            wu_p = jnp.pad(wu_p, ((0, 0), (0, lane_pad)))
            bu_p = jnp.pad(bu_p, ((0, 0), (0, lane_pad)))
            x2 = jnp.pad(x2, ((0, 0), (0, lane_pad)))
    h_p = wd_p.shape[1]

    # ---- pack rows into the 128-lane slab (pad only to the pack boundary) ----
    mp_needed = pl.cdiv(m, pack)                              # packed rows required
    m_padded = mp_needed * pack
    if m_padded != m:
        x2 = jnp.pad(x2, ((0, m_padded - m), (0, 0)))         # at most pack-1 rows
    xp = x2.reshape(mp_needed, d_p)                           # lane-dense slab (free reshape)

    # ---- row-tile sizing -----------------------------------------------------
    itemsize = jnp.dtype(x.dtype).itemsize
    row_align = 32 if itemsize == 1 else (16 if itemsize == 2 else 8)

    # big tiles, but keep >=2 grid steps when possible so v7x's 2nd TC isn't idle
    tm_eff = min(_round_up(tm, row_align),
                 _round_up(pl.cdiv(mp_needed, 2), row_align))
    tm_eff = max(tm_eff, row_align)

    vmem_ceiling = _vmem_ceiling_bytes()
    w_bytes = (wd_p.size * jnp.dtype(wd_p.dtype).itemsize
               + wu_p.size * jnp.dtype(wu_p.dtype).itemsize
               + bd_p.size * jnp.dtype(bd_p.dtype).itemsize
               + bu_p.size * jnp.dtype(bu_p.dtype).itemsize)

    def footprint(t):
        io = 2 * 2 * t * d_p * itemsize            # x + out, double-buffered
        temps = 4 * t * (2 * d_p + h_p)            # f32 x-cast / y / hidden temporaries
        return io + w_bytes + temps

    while footprint(tm_eff) > vmem_ceiling and tm_eff > row_align:
        tm_eff = max(row_align, _round_up(tm_eff // 2, row_align))

    if tm_eff >= mp_needed:
        tm_eff = mp_needed                         # single block == full row extent (legal)
    grid = pl.cdiv(mp_needed, tm_eff)              # uneven final block is masked by Pallas

    vmem_limit = int(min(max(footprint(tm_eff) + (2 << 20), 8 << 20), vmem_ceiling))

    def run(single_buffer_weights):
        if single_buffer_weights:
            # grid-invariant operands: single buffer, no redundant prologue DMA
            const = lambda s: pl.BlockSpec(s, lambda i: (0, 0),
                                           pipeline_mode=pl.Buffered(1))
        else:
            const = lambda s: pl.BlockSpec(s, lambda i: (0, 0))
        return pl.pallas_call(
            adapter_kernel,
            out_shape=jax.ShapeDtypeStruct((mp_needed, d_p), x.dtype),
            grid_spec=pltpu.PrefetchScalarGridSpec(
                num_scalar_prefetch=0,
                grid=(grid,),
                in_specs=[
                    pl.BlockSpec((tm_eff, d_p), lambda i: (i, 0)),   # x rows (lane-dense)
                    const(wd_p.shape),                               # W_down
                    const(bd_p.shape),                               # b_down
                    const(wu_p.shape),                               # W_up
                    const(bu_p.shape),                               # b_up
                ],
                out_specs=pl.BlockSpec((tm_eff, d_p), lambda i: (i, 0)),
            ),
            compiler_params=pltpu.CompilerParams(
                dimension_semantics=("parallel",),
                vmem_limit_bytes=vmem_limit,
            ),
        )(xp, wd_p, bd_p, wu_p, bu_p)

    try:
        out_p = run(True)
    except Exception:
        # fall back to default (double-buffered) weight specs if single-buffering
        # isn't supported by this jax version
        out_p = run(False)

    if pack > 1:
        out = out_p.reshape(m_padded, dim)
        if m_padded != m:
            out = out[:m]
    else:
        out = out_p[:, :dim] if lane_pad else out_p
    return out.reshape(orig_shape)


if __name__ == "__main__":
    # Adapter(dim=32, active='relu', skip_connect=True, reduction=4)
    dim = 32
    reduction = 4
    hidden = dim // reduction
    batch, seq = 2, 8

    key = jax.random.PRNGKey(0)
    kx, kwd, kbd, kwu, kbu = jax.random.split(key, 5)

    x = jax.random.normal(kx, (batch, seq, dim), dtype=jnp.float32)

    # PyTorch Linear weights are (out_features, in_features); store transposed (in, out).
    w_down = jax.random.normal(kwd, (dim, hidden), dtype=jnp.float32) * 0.1
    b_down = jax.random.normal(kbd, (hidden,), dtype=jnp.float32) * 0.1
    w_up = jax.random.normal(kwu, (hidden, dim), dtype=jnp.float32) * 0.1
    b_up = jax.random.normal(kbu, (dim,), dtype=jnp.float32) * 0.1

    out = adapter_forward(x, w_down, b_down, w_up, b_up)
    out = jax.block_until_ready(out)

    # Pure-JAX reference (same math as the PyTorch module: relu variant + skip).
    h_ref = jnp.maximum(x @ w_down + b_down, 0.0)
    ref = h_ref @ w_up + b_up + x
    assert out.shape == ref.shape
    assert jnp.allclose(out, ref, atol=1e-5, rtol=1e-5), "mismatch vs reference"

    print("KERNEL_OK")
</pallas_src>

<mosaic_0001>
module attributes {stable_mosaic.version = 11 : i64} {
  func.func @adapter_kernel(%arg0: i32, %arg1: memref<4x128xf32, #tpu.memory_space<vmem>>, %arg2: memref<128x32xf32, #tpu.memory_space<vmem>>, %arg3: memref<1x32xf32, #tpu.memory_space<vmem>>, %arg4: memref<32x128xf32, #tpu.memory_space<vmem>>, %arg5: memref<1x128xf32, #tpu.memory_space<vmem>>, %arg6: memref<4x128xf32, #tpu.memory_space<vmem>>) attributes {dimension_semantics = [#tpu.dimension_semantics<parallel>], iteration_bounds = array<i64: 1>, scalar_prefetch = 0 : i64, scratch_operands = 0 : i64, tpu.core_type = #tpu.core_type<tc>, window_params = [{transform_indices = @transform_0, window_bounds = array<i64: 4, 128>}, {pipeline_mode = #tpu.pipeline_mode<synchronous>, transform_indices = @transform_1, window_bounds = array<i64: 128, 32>}, {pipeline_mode = #tpu.pipeline_mode<synchronous>, transform_indices = @transform_2, window_bounds = array<i64: 1, 32>}, {pipeline_mode = #tpu.pipeline_mode<synchronous>, transform_indices = @transform_3, window_bounds = array<i64: 32, 128>}, {pipeline_mode = #tpu.pipeline_mode<synchronous>, transform_indices = @transform_4, window_bounds = array<i64: 1, 128>}, {transform_indices = @transform_5, window_bounds = array<i64: 4, 128>}]} {
    %c0 = arith.constant 0 : index
    %c0_0 = arith.constant 0 : index
    %0 = vector.load %arg1[%c0, %c0_0] : memref<4x128xf32, #tpu.memory_space<vmem>>, vector<4x128xf32>
    %c0_1 = arith.constant 0 : index
    %c0_2 = arith.constant 0 : index
    %1 = vector.load %arg2[%c0_1, %c0_2] : memref<128x32xf32, #tpu.memory_space<vmem>>, vector<128x32xf32>
    %cst = arith.constant dense<0.000000e+00> : vector<4x32xf32>
    %2 = tpu.matmul %0, %1, %cst {dimension_numbers = #tpu.dot_dimension_numbers<[1], [0], [0], [1], [0, 0, 1, 1], [], []>} : vector<4x128xf32>, vector<128x32xf32>, vector<4x32xf32> -> vector<4x32xf32>
    %c0_3 = arith.constant 0 : index
    %c0_4 = arith.constant 0 : index
    %3 = vector.load %arg3[%c0_3, %c0_4] : memref<1x32xf32, #tpu.memory_space<vmem>>, vector<1x32xf32>
    %4 = vector.broadcast %3 : vector<1x32xf32> to vector<4x32xf32>
    %5 = arith.addf %2, %4 : vector<4x32xf32>
    %cst_5 = arith.constant 0.000000e+00 : f32
    %6 = vector.broadcast %cst_5 : f32 to vector<4x32xf32>
    %7 = arith.maximumf %5, %6 : vector<4x32xf32>
    %c0_6 = arith.constant 0 : index
    %c0_7 = arith.constant 0 : index
    %8 = vector.load %arg4[%c0_6, %c0_7] : memref<32x128xf32, #tpu.memory_space<vmem>>, vector<32x128xf32>
    %cst_8 = arith.constant dense<0.000000e+00> : vector<4x128xf32>
    %9 = tpu.matmul %7, %8, %cst_8 {dimension_numbers = #tpu.dot_dimension_numbers<[1], [0], [0], [1], [0, 0, 1, 1], [], []>} : vector<4x32xf32>, vector<32x128xf32>, vector<4x128xf32> -> vector<4x128xf32>
    %c0_9 = arith.constant 0 : index
    %c0_10 = arith.constant 0 : index
    %10 = vector.load %arg5[%c0_9, %c0_10] : memref<1x128xf32, #tpu.memory_space<vmem>>, vector<1x128xf32>
    %11 = vector.broadcast %10 : vector<1x128xf32> to vector<4x128xf32>
    %12 = arith.addf %9, %11 : vector<4x128xf32>
    %13 = arith.addf %12, %0 : vector<4x128xf32>
    %c0_11 = arith.constant 0 : index
    %c0_12 = arith.constant 0 : index
    %14 = vector.load %arg6[%c0_11, %c0_12] : memref<4x128xf32, #tpu.memory_space<vmem>>, vector<4x128xf32>
    tpu.vector_store %arg6[%c0_11, %c0_12], %13 {strides = array<i32>} : memref<4x128xf32, #tpu.memory_space<vmem>>, vector<4x128xf32>,
    return
  }
  func.func @transform_0(%arg0: i32) -> (i32, i32) {
    %c0_i32 = arith.constant 0 : i32
    %c0_i32_0 = arith.constant 0 : i32
    return %arg0, %c0_i32 : i32, i32
  }
  func.func @transform_1(%arg0: i32) -> (i32, i32) {
    %c0_i32 = arith.constant 0 : i32
    %c0_i32_0 = arith.constant 0 : i32
    %c0_i32_1 = arith.constant 0 : i32
    return %c0_i32, %c0_i32_0 : i32, i32
  }
  func.func @transform_2(%arg0: i32) -> (i32, i32) {
    %c0_i32 = arith.constant 0 : i32
    %c0_i32_0 = arith.constant 0 : i32
    %c0_i32_1 = arith.constant 0 : i32
    return %c0_i32, %c0_i32_0 : i32, i32
  }
  func.func @transform_3(%arg0: i32) -> (i32, i32) {
    %c0_i32 = arith.constant 0 : i32
    %c0_i32_0 = arith.constant 0 : i32
    %c0_i32_1 = arith.constant 0 : i32
    return %c0_i32, %c0_i32_0 : i32, i32
  }
  func.func @transform_4(%arg0: i32) -> (i32, i32) {
    %c0_i32 = arith.constant 0 : i32
    %c0_i32_0 = arith.constant 0 : i32
    %c0_i32_1 = arith.constant 0 : i32
    return %c0_i32, %c0_i32_0 : i32, i32
  }
  func.func @transform_5(%arg0: i32) -> (i32, i32) {
    %c0_i32 = arith.constant 0 : i32
    %c0_i32_0 = arith.constant 0 : i32
    return %arg0, %c0_i32 : i32, i32
  }
}

module attributes {stable_mosaic.version = 11 : i64} {
  func.func @adapter_kernel(%arg0: i32, %arg1: memref<4x128xf32, #tpu.memory_space<vmem>>, %arg2: memref<128x32xf32, #tpu.memory_space<vmem>>, %arg3: memref<1x32xf32, #tpu.memory_space<vmem>>, %arg4: memref<32x128xf32, #tpu.memory_space<vmem>>, %arg5: memref<1x128xf32, #tpu.memory_space<vmem>>, %arg6: memref<4x128xf32, #tpu.memory_space<vmem>>) attributes {dimension_semantics = [#tpu.dimension_semantics<parallel>], iteration_bounds = array<i64: 1>, scalar_prefetch = 0 : i64, scratch_operands = 0 : i64, tpu.core_type = #tpu.core_type<tc>, window_params = [{transform_indices = @transform_0, window_bounds = array<i64: 4, 128>}, {pipeline_mode = #tpu.pipeline_mode<synchronous>, transform_indices = @transform_1, window_bounds = array<i64: 128, 32>}, {pipeline_mode = #tpu.pipeline_mode<synchronous>, transform_indices = @transform_2, window_bounds = array<i64: 1, 32>}, {pipeline_mode = #tpu.pipeline_mode<synchronous>, transform_indices = @transform_3, window_bounds = array<i64: 32, 128>}, {pipeline_mode = #tpu.pipeline_mode<synchronous>, transform_indices = @transform_4, window_bounds = array<i64: 1, 128>}, {transform_indices = @transform_5, window_bounds = array<i64: 4, 128>}]} {
    %c0 = arith.constant 0 : index
    %c0_0 = arith.constant 0 : index
    %0 = vector.load %arg1[%c0, %c0_0] : memref<4x128xf32, #tpu.memory_space<vmem>>, vector<4x128xf32>
    %c0_1 = arith.constant 0 : index
    %c0_2 = arith.constant 0 : index
    %1 = vector.load %arg2[%c0_1, %c0_2] : memref<128x32xf32, #tpu.memory_space<vmem>>, vector<128x32xf32>
    %cst = arith.constant dense<0.000000e+00> : vector<4x32xf32>
    %2 = tpu.matmul %0, %1, %cst {dimension_numbers = #tpu.dot_dimension_numbers<[1], [0], [0], [1], [0, 0, 1, 1], [], []>} : vector<4x128xf32>, vector<128x32xf32>, vector<4x32xf32> -> vector<4x32xf32>
    %c0_3 = arith.constant 0 : index
    %c0_4 = arith.constant 0 : index
    %3 = vector.load %arg3[%c0_3, %c0_4] : memref<1x32xf32, #tpu.memory_space<vmem>>, vector<1x32xf32>
    %4 = vector.broadcast %3 : vector<1x32xf32> to vector<4x32xf32>
    %5 = arith.addf %2, %4 : vector<4x32xf32>
    %cst_5 = arith.constant 0.000000e+00 : f32
    %6 = vector.broadcast %cst_5 : f32 to vector<4x32xf32>
    %7 = arith.maximumf %5, %6 : vector<4x32xf32>
    %c0_6 = arith.constant 0 : index
    %c0_7 = arith.constant 0 : index
    %8 = vector.load %arg4[%c0_6, %c0_7] : memref<32x128xf32, #tpu.memory_space<vmem>>, vector<32x128xf32>
    %cst_8 = arith.constant dense<0.000000e+00> : vector<4x128xf32>
    %9 = tpu.matmul %7, %8, %cst_8 {dimension_numbers = #tpu.dot_dimension_numbers<[1], [0], [0], [1], [0, 0, 1, 1], [], []>} : vector<4x32xf32>, vector<32x128xf32>, vector<4x128xf32> -> vector<4x128xf32>
    %c0_9 = arith.constant 0 : index
    %c0_10 = arith.constant 0 : index
    %10 = vector.load %arg5[%c0_9, %c0_10] : memref<1x128xf32, #tpu.memory_space<vmem>>, vector<1x128xf32>
    %11 = vector.broadcast %10 : vector<1x128xf32> to vector<4x128xf32>
    %12 = arith.addf %9, %11 : vector<4x128xf32>
    %13 = arith.addf %12, %0 : vector<4x128xf32>
    %c0_11 = arith.constant 0 : index
    %c0_12 = arith.constant 0 : index
    %14 = vector.load %arg6[%c0_11, %c0_12] : memref<4x128xf32, #tpu.memory_space<vmem>>, vector<4x128xf32>
    tpu.vector_store %arg6[%c0_11, %c0_12], %13 {strides = array<i32>} : memref<4x128xf32, #tpu.memory_space<vmem>>, vector<4x128xf32>,
    return
  }
  func.func @transform_0(%arg0: i32) -> (i32, i32) {
    %c0_i32 = arith.constant 0 : i32
    %c0_i32_0 = arith.constant 0 : i32
    return %arg0, %c0_i32 : i32, i32
  }
  func.func @transform_1(%arg0: i32) -> (i32, i32) {
    %c0_i32 = arith.constant 0 : i32
    %c0_i32_0 = arith.constant 0 : i32
    %c0_i32_1 = arith.constant 0 : i32
    return %c0_i32, %c0_i32_0 : i32, i32
  }
  func.func @transform_2(%arg0: i32) -> (i32, i32) {
    %c0_i32 = arith.constant 0 : i32
    %c0_i32_0 = arith.constant 0 : i32
    %c0_i32_1 = arith.constant 0 : i32
    return %c0_i32, %c0_i32_0 : i32, i32
  }
  func.func @transform_3(%arg0: i32) -> (i32, i32) {
    %c0_i32 = arith.constant 0 : i32
    %c0_i32_0 = arith.constant 0 : i32
    %c0_i32_1 = arith.constant 0 : i32
    return %c0_i32, %c0_i32_0 : i32, i32
  }
  func.func @transform_4(%arg0: i32) -> (i32, i32) {
    %c0_i32 = arith.constant 0 : i32
    %c0_i32_0 = arith.constant 0 : i32
    %c0_i32_1 = arith.constant 0 : i32
    return %c0_i32, %c0_i32_0 : i32, i32
  }
  func.func @transform_5(%arg0: i32) -> (i32, i32) {
    %c0_i32 = arith.constant 0 : i32
    %c0_i32_0 = arith.constant 0 : i32
    return %arg0, %c0_i32 : i32, i32
  }
}

</mosaic_0001>

<bundles_post_ra>
// kernel: tpu_custom_call.1
= control target key start
LH: loop header
LB: loop body
LE: loop exit
PB: predicated region body
PF: predicated region fallthrough
CT: control target
= control target key end

     0   :  { %v346_v3 = vmov 0.0|0.0   ;;  %vm347_vm0 = vmmov 0   ;;  %v348_v6 = vmov 0.0   ;;  %s461_s0 = inlined_call_operand.vmem [shape: f32[4,128], index: 0, kind: input, shape index: {}]   ;;  %s462_s1 = inlined_call_operand.vmem [shape: f32[128,32], index: 1, kind: input, shape index: {}]   ;;  %s463_s2 = inlined_call_operand.vmem [shape: f32[1,32], index: 2, kind: input, shape index: {}]   ;;  %s464_s3 = inlined_call_operand.vmem [shape: f32[32,128], index: 3, kind: input, shape index: {}]   ;;  %s465_s4 = inlined_call_operand.vmem [shape: f32[1,128], index: 4, kind: input, shape index: {}]   ;;  %s466_s5 = inlined_call_operand.hbm [shape: f32[4,128], index: 5, kind: output, shape index: {}]  }
   0x1   :  { %v22_v0 = vld [vmem:[%s462_s1] sm:$0xff]  ;;  %v23_v1 = vld [vmem:[%s462_s1 + $0x8] sm:$0xff]  ;;  %v24_v2 = vld [vmem:[%s462_s1 + $0x10] sm:$0xff]  ;;  %288 = vmatprep.subr.bf16.mxu0 %v346_v3  ;;  %274 = vmatprep.mubr.msk.f32.mxu0 %vm347_vm0, %v348_v6 }
   0x2   :  { %v289_v4 = vpack.c.bf16 %v23_v1, %v22_v0  ;;  %v25_v5 = vld [vmem:[%s462_s1 + $0x18] sm:$0xff]  ;;  %312 = vmatprep.subr.bf16.mxu1 %v346_v3  ;;  %285 = vmatprep.mubr.msk.f32.mxu1 %vm347_vm0, %v348_v6  ;;  %v26_v8 = vld [vmem:[%s462_s1 + $0x20] sm:$0xff]  ;;  %v27_v9 = vld [vmem:[%s462_s1 + $0x28] sm:$0xff] }
   0x3   :  { %v292_v7 = vpack.c.bf16 %v25_v5, %v24_v2  ;;  %v116_v10 = vld [vmem:[%s464_s3] sm:$0xff]  ;;  %v117_v11 = vld [vmem:[%s464_s3 + $0x8] sm:$0xff] }
   0x4   :  { %290 = vmatpush3.bf16.msra.mxu0 %v289_v4 }
   0x5   :  { %291 = vmatprep.subr.bf16.mxu0 %v346_v3 }
   0x6   :  { %10 = vsyncpa [#allocation3], 0  ;;  %v295_v12 = vpack.c.bf16 %v27_v9, %v26_v8  ;;  %v313_v13 = vpack.c.bf16 %v117_v11, %v116_v10  ;;  %v28_v14 = vld [vmem:[%s462_s1 + $0x30] sm:$0xff]  ;;  %v29_v15 = vld [vmem:[%s462_s1 + $0x38] sm:$0xff]  ;;  %vm127_vm1 = vcmask 261120   ;;  %s349_s12 = smov [#allocation2]  }
   0x7   :  { %v298_v16 = vpack.c.bf16 %v29_v15, %v28_v14  ;;  %v30_v17 = vld [vmem:[%s462_s1 + $0x40] sm:$0xff]  ;;  %v31_v18 = vld [vmem:[%s462_s1 + $0x48] sm:$0xff]  ;;  %v32_v20 = vld [vmem:[%s462_s1 + $0x50] sm:$0xff]  ;;  %s209_s13 = sshll.u32 %s349_s12, 4  ;;  %s210_s13 = int_to_ptr.vmem [resolvable:$true] %s209_s13 }
   0x8   :  { %293 = vmatpush3.bf16.msra.mxu0 %v292_v7  ;;  %314 = vmatpush3.bf16.msra.mxu1 %v313_v13  ;;  %v301_v19 = vpack.c.bf16 %v31_v18, %v30_v17  ;;  %v33_v21 = vld [vmem:[%s462_s1 + $0x58] sm:$0xff]  ;;  %v34_v23 = vld [vmem:[%s462_s1 + $0x60] sm:$0xff]  ;;  %v35_v24 = vld [vmem:[%s462_s1 + $0x68] sm:$0xff]  ;;  %p327_p1 = scmp.lt.s32.totalorder %s210_s13, %s210_s13 }
   0x9   :  { %294 = vmatprep.subr.bf16.mxu0 %v346_v3  ;;  %315 = vmatprep.subr.bf16.mxu1 %v346_v3  ;;  %v304_v22 = vpack.c.bf16 %v33_v21, %v32_v20  ;;  %v307_v25 = vpack.c.bf16 %v35_v24, %v34_v23  ;;  %v36_v26 = vld [vmem:[%s462_s1 + $0x70] sm:$0xff]  ;;  %v37_v27 = vld [vmem:[%s462_s1 + $0x78] sm:$0xff]  ;;  %v21_v29 = vld [vmem:[%s461_s0] sm:$0xf] }
   0xa   :  { %v310_v28 = vpack.c.bf16 %v37_v27, %v36_v26  ;;  %v118_v30 = vld [vmem:[%s464_s3 + $0x10] sm:$0xff]  ;;  %v119_v31 = vld [vmem:[%s464_s3 + $0x18] sm:$0xff]  ;;  %v217_v33 = vld [vmem:[%s463_s2] ss:$0 sm:$0xff]  ;;  %s322_s3 = scalar_lea.vmem %s210_s13, 64 }
   0xb   :  { %v316_v32 = vpack.c.bf16 %v119_v31, %v118_v30  ;;  %v218_v38 = vld [vmem:[%s465_s4] ss:$0 sm:$0xff]  ;;  %p323_p0 = scmp.ne.s32.totalorder %s210_s13, %s322_s3  ;;  %p328_p2 = scmp.lt.s32.totalorder %s322_s3, %s322_s3 }
   0xc   :  { %296 = vmatpush3.bf16.msra.mxu0 %v295_v12 }
   0xd   :  { %297 = vmatprep.subr.bf16.mxu0 %v346_v3  ;;  %317 = vmatpush3.bf16.msra.mxu1 %v316_v32  ;;  %p329_p3 = por %p328_p2, %p327_p1 }
   0xf   :  { %p330_p4 = pnand %p329_p3, %p323_p0 }
  0x10   :  { %299 = vmatpush3.bf16.msra.mxu0 %v298_v16 }
  0x11   :  { %300 = vmatprep.subr.bf16.mxu0 %v346_v3 }
  0x14   :  { %302 = vmatpush3.bf16.msra.mxu0 %v301_v19 }
  0x15   :  { %303 = vmatprep.subr.bf16.mxu0 %v346_v3 }
  0x18   :  { %305 = vmatpush3.bf16.msra.mxu0 %v304_v22 }
  0x19   :  { %306 = vmatprep.subr.bf16.mxu0 %v346_v3 }
  0x1c   :  { %308 = vmatpush3.bf16.msra.mxu0 %v307_v25 }
  0x1d   :  { %309 = vmatprep.subr.bf16.mxu0 %v346_v3 }
  0x20   :  { %311 = vmatpush3.bf16.msra.mxu0 %v310_v28 }
  0x23   :  { %275 = vmatmul.mubr.f32.vlgmr.msra.gmra.mrb[0].mxu0 %v21_v29 }
  0xf6   :  { %v111_v34 = vpop.f32.mrb[0].mxu0 }
  0xf7   :  { %v112_v35 = vadd.f32 %v217_v33, %v111_v34  ;;  %v276_v36 = vpop.f32.mrb[1].mxu0 }
  0xf9   :  { %v115_v37 = vmax.f32 %v112_v35, 0.0 }
  0xfb   :  { %286 = vmatmul.mubr.msk.f32.vlgmr.msra.gmra.mrb[0].mxu1 %vm127_vm1, %v115_v37 }
 0x1ce   :  { %v197_v39 = vpop.f32.mrb[0].mxu1 }
 0x1cf   :  { %v198_v40 = vadd.f32 %v218_v38, %v197_v39  ;;  %v287_v41 = vpop.f32.mrb[1].mxu1 }
 0x1d1   :  { %v201_v42 = vadd.f32 %v198_v40, %v21_v29 }
 0x1d3   :  { %202 = vst [vmem:[#allocation2] sm:$0xf] %v201_v42 }
 0x1d4   :  { %333 = shalt.err (!%p330_p4)
}
 0x1d5   :  { %s334_s15 = scalar_lea.hbm %s466_s5, 64 }
 0x1d6   :  { %p335_p5 = scmp.ne.s32.totalorder %s466_s5, %s334_s15  ;;  %p338_p6 = scmp.lt.u32.totalorder %s334_s15, %s466_s5 }
 0x1d8   :  { %p340_p7 = pnand %p338_p6, %p335_p5 }
 0x1da   :  { %343 = shalt.err (!%p340_p7)
}
 0x1db   :  { %212 = dma.vmem_to_hbm [thread:$0]  %s210_s13, 64, %s466_s5, [#allocation3]  }
 0x1dc   :  { %344 = dma.done.wait [#allocation3], 64  }
 0x1dd   :  { %345 = vsyncadd [#allocation3], 4294967232 }
 0x1de   :  { %216 = vsyncpa [#allocation3], 1 }

// kernel: tpu_custom_call.1
= control target key start
LH: loop header
LB: loop body
LE: loop exit
PB: predicated region body
PF: predicated region fallthrough
CT: control target
= control target key end

     0   :  { %v346_v3 = vmov 0.0|0.0   ;;  %vm347_vm0 = vmmov 0   ;;  %v348_v6 = vmov 0.0   ;;  %s461_s0 = inlined_call_operand.vmem [shape: f32[4,128], index: 0, kind: input, shape index: {}]   ;;  %s462_s1 = inlined_call_operand.vmem [shape: f32[128,32], index: 1, kind: input, shape index: {}]   ;;  %s463_s2 = inlined_call_operand.vmem [shape: f32[1,32], index: 2, kind: input, shape index: {}]   ;;  %s464_s3 = inlined_call_operand.vmem [shape: f32[32,128], index: 3, kind: input, shape index: {}]   ;;  %s465_s4 = inlined_call_operand.vmem [shape: f32[1,128], index: 4, kind: input, shape index: {}]   ;;  %s466_s5 = inlined_call_operand.hbm [shape: f32[4,128], index: 5, kind: output, shape index: {}]  }
   0x1   :  { %v22_v0 = vld [vmem:[%s462_s1] sm:$0xff]  ;;  %v23_v1 = vld [vmem:[%s462_s1 + $0x8] sm:$0xff]  ;;  %v24_v2 = vld [vmem:[%s462_s1 + $0x10] sm:$0xff]  ;;  %288 = vmatprep.subr.bf16.mxu0 %v346_v3  ;;  %274 = vmatprep.mubr.msk.f32.mxu0 %vm347_vm0, %v348_v6 }
   0x2   :  { %v289_v4 = vpack.c.bf16 %v23_v1, %v22_v0  ;;  %v25_v5 = vld [vmem:[%s462_s1 + $0x18] sm:$0xff]  ;;  %312 = vmatprep.subr.bf16.mxu1 %v346_v3  ;;  %285 = vmatprep.mubr.msk.f32.mxu1 %vm347_vm0, %v348_v6  ;;  %v26_v8 = vld [vmem:[%s462_s1 + $0x20] sm:$0xff]  ;;  %v27_v9 = vld [vmem:[%s462_s1 + $0x28] sm:$0xff] }
   0x3   :  { %v292_v7 = vpack.c.bf16 %v25_v5, %v24_v2  ;;  %v116_v10 = vld [vmem:[%s464_s3] sm:$0xff]  ;;  %v117_v11 = vld [vmem:[%s464_s3 + $0x8] sm:$0xff] }
   0x4   :  { %290 = vmatpush3.bf16.msra.mxu0 %v289_v4 }
   0x5   :  { %291 = vmatprep.subr.bf16.mxu0 %v346_v3 }
   0x6   :  { %10 = vsyncpa [#allocation3], 0  ;;  %v295_v12 = vpack.c.bf16 %v27_v9, %v26_v8  ;;  %v313_v13 = vpack.c.bf16 %v117_v11, %v116_v10  ;;  %v28_v14 = vld [vmem:[%s462_s1 + $0x30] sm:$0xff]  ;;  %v29_v15 = vld [vmem:[%s462_s1 + $0x38] sm:$0xff]  ;;  %vm127_vm1 = vcmask 261120   ;;  %s349_s12 = smov [#allocation2]  }
   0x7   :  { %v298_v16 = vpack.c.bf16 %v29_v15, %v28_v14  ;;  %v30_v17 = vld [vmem:[%s462_s1 + $0x40] sm:$0xff]  ;;  %v31_v18 = vld [vmem:[%s462_s1 + $0x48] sm:$0xff]  ;;  %v32_v20 = vld [vmem:[%s462_s1 + $0x50] sm:$0xff]  ;;  %s209_s13 = sshll.u32 %s349_s12, 4  ;;  %s210_s13 = int_to_ptr.vmem [resolvable:$true] %s209_s13 }
   0x8   :  { %293 = vmatpush3.bf16.msra.mxu0 %v292_v7  ;;  %314 = vmatpush3.bf16.msra.mxu1 %v313_v13  ;;  %v301_v19 = vpack.c.bf16 %v31_v18, %v30_v17  ;;  %v33_v21 = vld [vmem:[%s462_s1 + $0x58] sm:$0xff]  ;;  %v34_v23 = vld [vmem:[%s462_s1 + $0x60] sm:$0xff]  ;;  %v35_v24 = vld [vmem:[%s462_s1 + $0x68] sm:$0xff]  ;;  %p327_p1 = scmp.lt.s32.totalorder %s210_s13, %s210_s13 }
   0x9   :  { %294 = vmatprep.subr.bf16.mxu0 %v346_v3  ;;  %315 = vmatprep.subr.bf16.mxu1 %v346_v3  ;;  %v304_v22 = vpack.c.bf16 %v33_v21, %v32_v20  ;;  %v307_v25 = vpack.c.bf16 %v35_v24, %v34_v23  ;;  %v36_v26 = vld [vmem:[%s462_s1 + $0x70] sm:$0xff]  ;;  %v37_v27 = vld [vmem:[%s462_s1 + $0x78] sm:$0xff]  ;;  %v21_v29 = vld [vmem:[%s461_s0] sm:$0xf] }
   0xa   :  { %v310_v28 = vpack.c.bf16 %v37_v27, %v36_v26  ;;  %v118_v30 = vld [vmem:[%s464_s3 + $0x10] sm:$0xff]  ;;  %v119_v31 = vld [vmem:[%s464_s3 + $0x18] sm:$0xff]  ;;  %v217_v33 = vld [vmem:[%s463_s2] ss:$0 sm:$0xff]  ;;  %s322_s3 = scalar_lea.vmem %s210_s13, 64 }
   0xb   :  { %v316_v32 = vpack.c.bf16 %v119_v31, %v118_v30  ;;  %v218_v38 = vld [vmem:[%s465_s4] ss:$0 sm:$0xff]  ;;  %p323_p0 = scmp.ne.s32.totalorder %s210_s13, %s322_s3  ;;  %p328_p2 = scmp.lt.s32.totalorder %s322_s3, %s322_s3 }
   0xc   :  { %296 = vmatpush3.bf16.msra.mxu0 %v295_v12 }
   0xd   :  { %297 = vmatprep.subr.bf16.mxu0 %v346_v3  ;;  %317 = vmatpush3.bf16.msra.mxu1 %v316_v32  ;;  %p329_p3 = por %p328_p2, %p327_p1 }
   0xf   :  { %p330_p4 = pnand %p329_p3, %p323_p0 }
  0x10   :  { %299 = vmatpush3.bf16.msra.mxu0 %v298_v16 }
  0x11   :  { %300 = vmatprep.subr.bf16.mxu0 %v346_v3 }
  0x14   :  { %302 = vmatpush3.bf16.msra.mxu0 %v301_v19 }
  0x15   :  { %303 = vmatprep.subr.bf16.mxu0 %v346_v3 }
  0x18   :  { %305 = vmatpush3.bf16.msra.mxu0 %v304_v22 }
  0x19   :  { %306 = vmatprep.subr.bf16.mxu0 %v346_v3 }
  0x1c   :  { %308 = vmatpush3.bf16.msra.mxu0 %v307_v25 }
  0x1d   :  { %309 = vmatprep.subr.bf16.mxu0 %v346_v3 }
  0x20   :  { %311 = vmatpush3.bf16.msra.mxu0 %v310_v28 }
  0x23   :  { %275 = vmatmul.mubr.f32.vlgmr.msra.gmra.mrb[0].mxu0 %v21_v29 }
  0xf6   :  { %v111_v34 = vpop.f32.mrb[0].mxu0 }
  0xf7   :  { %v112_v35 = vadd.f32 %v217_v33, %v111_v34  ;;  %v276_v36 = vpop.f32.mrb[1].mxu0 }
  0xf9   :  { %v115_v37 = vmax.f32 %v112_v35, 0.0 }
  0xfb   :  { %286 = vmatmul.mubr.msk.f32.vlgmr.msra.gmra.mrb[0].mxu1 %vm127_vm1, %v115_v37 }
 0x1ce   :  { %v197_v39 = vpop.f32.mrb[0].mxu1 }
 0x1cf   :  { %v198_v40 = vadd.f32 %v218_v38, %v197_v39  ;;  %v287_v41 = vpop.f32.mrb[1].mxu1 }
 0x1d1   :  { %v201_v42 = vadd.f32 %v198_v40, %v21_v29 }
 0x1d3   :  { %202 = vst [vmem:[#allocation2] sm:$0xf] %v201_v42 }
 0x1d4   :  { %333 = shalt.err (!%p330_p4)
}
 0x1d5   :  { %s334_s15 = scalar_lea.hbm %s466_s5, 64 }
 0x1d6   :  { %p335_p5 = scmp.ne.s32.totalorder %s466_s5, %s334_s15  ;;  %p338_p6 = scmp.lt.u32.totalorder %s334_s15, %s466_s5 }
 0x1d8   :  { %p340_p7 = pnand %p338_p6, %p335_p5 }
 0x1da   :  { %343 = shalt.err (!%p340_p7)
}
 0x1db   :  { %212 = dma.vmem_to_hbm [thread:$0]  %s210_s13, 64, %s466_s5, [#allocation3]  }
 0x1dc   :  { %344 = dma.done.wait [#allocation3], 64  }
 0x1dd   :  { %345 = vsyncadd [#allocation3], 4294967232 }
 0x1de   :  { %216 = vsyncpa [#allocation3], 1 }

</bundles_post_ra>
